<compile_context>
chip_gen: v7x
topology: tpu7x:2x2x1
jax: 0.10.0
libtpu: 0.0.40
codegen_flags: <defaults>
</compile_context>

<pallas_src>
import functools

import jax
import jax.numpy as jnp
import numpy as np
from jax import lax
from jax.experimental import pallas as pl
from jax.experimental.pallas import tpu as pltpu

_LANES = 128     # vreg lane width
_SUBLANES = 8    # vreg sublane count (f32)


def _eiou_kernel(preds_ref, target_ref, out_ref, *, n_valid, inner_tiles, strip):
    """One (core_split, batch_tile) grid step of the EfficientIoU loss.

    preds_ref  : VMEM (5, R, 128) f32, coordinate-major tile
                 coords are [objectness, x1, y1, x2, y2] logits
    target_ref : VMEM (5, R, 128) f32
    out_ref    : VMEM (2, strip, 128) f32 per-core partial sums
                 (row 0: box-loss sum, row 1: BCE sum); accumulated across the
                 inner ("arbitrary") grid axis, combined outside in XLA.
    """
    t = pl.program_id(1)
    r_tile = preds_ref.shape[1]
    n_strips = r_tile // strip

    gtile = pl.program_id(0) * inner_tiles + t
    tile_box_offset = gtile * (r_tile * _LANES)

    # Local box index within one strip, hoisted out of the loop.
    base_idx = (lax.broadcasted_iota(jnp.int32, (strip, _LANES), 0) * _LANES
                + lax.broadcasted_iota(jnp.int32, (strip, _LANES), 1))

    @pl.when(t == 0)
    def _init():
        out_ref[...] = jnp.zeros_like(out_ref)

    def strip_body(s, carry):
        box_acc, bce_acc = carry
        r0 = pl.multiple_of(s * strip, strip)

        def ld(ref, i):
            return ref[i, pl.ds(r0, strip), :]            # (strip, 128)

        # ---- EIoU box loss (one vreg-strip of boxes) -----------------------
        # sigmoid(x) = 0.5*tanh(0.5x) + 0.5  -> one EUP op per element.
        px1 = 0.5 * jnp.tanh(0.5 * ld(preds_ref, 1)) + 0.5
        py1 = 0.5 * jnp.tanh(0.5 * ld(preds_ref, 2)) + 0.5
        px2 = 0.5 * jnp.tanh(0.5 * ld(preds_ref, 3)) + 0.5
        py2 = 0.5 * jnp.tanh(0.5 * ld(preds_ref, 4)) + 0.5
        tx1 = ld(target_ref, 1)
        ty1 = ld(target_ref, 2)
        tx2 = ld(target_ref, 3)
        ty2 = ld(target_ref, 4)

        xp1 = jnp.minimum(px1, px2)
        xp2 = jnp.maximum(px1, px2)
        yp1 = jnp.minimum(py1, py2)
        yp2 = jnp.maximum(py1, py2)

        ix1 = jnp.maximum(xp1, tx1)
        ix2 = jnp.minimum(xp2, tx2)
        iy1 = jnp.maximum(yp1, ty1)
        iy2 = jnp.minimum(yp2, ty2)
        overlap = jnp.maximum((ix2 - ix1) * (iy2 - iy1), 0.0)

        c_w = jnp.maximum(xp2, tx2) - jnp.minimum(xp1, tx1)
        c_h = jnp.maximum(yp2, ty2) - jnp.minimum(yp1, ty1)
        w = xp2 - xp1
        h = yp2 - yp1
        w_t = tx2 - tx1
        h_t = ty2 - ty1

        union = w_t * h_t + w * h - overlap
        dcx = 0.5 * ((xp2 + xp1) - (tx2 + tx1))
        dcy = 0.5 * ((yp2 + yp1) - (ty2 + ty1))
        cw2 = c_w * c_w
        diag = cw2 + c_h * c_h

        # iou = overlap/union and center_part = (dcx^2+dcy^2)/diag share one
        # reciprocal; weight_part/height_part share a second one.
        r_ud = pl.reciprocal(union * diag, approx=True)
        iou = overlap * diag * r_ud
        center_part = (dcx * dcx + dcy * dcy) * union * r_ud

        ht2 = h_t * h_t
        dw = w - w_t
        dh = h - h_t
        r_wh = pl.reciprocal(cw2 * ht2, approx=True)
        weight_part = dw * dw * ht2 * r_wh
        height_part = dh * dh * cw2 * r_wh

        box_loss = 1.0 - (iou - (center_part + weight_part + height_part))

        # ---- BCE-with-logits on the objectness row (stable formulation) ----
        x = ld(preds_ref, 0)
        y = ld(target_ref, 0)
        bce = jnp.maximum(x, 0.0) - x * y + jnp.log1p(jnp.exp(-jnp.abs(x)))

        # ---- tail mask: hoisted iota, scalar threshold, two selects ---------
        thr = n_valid - tile_box_offset - s * (strip * _LANES)
        valid = base_idx < thr
        box_acc = box_acc + jnp.where(valid, box_loss, 0.0)
        bce_acc = bce_acc + jnp.where(valid, bce, 0.0)
        return box_acc, bce_acc

    zero = jnp.zeros((strip, _LANES), jnp.float32)
    # Partial sums stay in vregs across strips; no per-strip VMEM traffic.
    box_sum, bce_sum = lax.fori_loop(0, n_strips, strip_body, (zero, zero))

    out_ref[0] += box_sum
    out_ref[1] += bce_sum


@functools.partial(
    jax.jit, static_argnames=("max_tile_rows", "num_core_splits", "strip"))
def efficient_iou_loss(preds, target, bce_coeff=0.2, *,
                       max_tile_rows=512, num_core_splits=2, strip=8):
    """preds, target: (N, 5) float — rows are [objectness, x1, y1, x2, y2]."""
    n = preds.shape[0]
    assert preds.shape == (n, 5) and target.shape == (n, 5)
    assert n >= 1
    assert strip % _SUBLANES == 0

    max_tile_rows = max(strip, (max_tile_rows // strip) * strip)

    rows_needed = -(-n // _LANES)                        # ceil(n / 128)
    rows_needed = -(-rows_needed // strip) * strip       # multiple of strip
    tile_rows = min(rows_needed, max_tile_rows)          # rows per grid step
    total_tiles = -(-rows_needed // tile_rows)
    n_split = max(1, min(num_core_splits, total_tiles))  # leading parallel axis
    inner_tiles = -(-total_tiles // n_split)
    total_tiles = inner_tiles * n_split
    rows = total_tiles * tile_rows
    n_pad = rows * _LANES

    def to_coord_major(arr):
        arr = jnp.asarray(arr, jnp.float32)
        arr = jnp.pad(arr, ((0, n_pad - n), (0, 0)))
        # One fused pad+transpose+reshape under jit.  If the producer can emit
        # the (5, N) coordinate-major layout directly, this HBM pass vanishes.
        return jnp.transpose(arr).reshape(5, rows, _LANES)

    preds_cm = to_coord_major(preds)
    target_cm = to_coord_major(target)

    partial_sums = pl.pallas_call(
        functools.partial(_eiou_kernel, n_valid=n, inner_tiles=inner_tiles,
                          strip=strip),
        grid=(n_split, inner_tiles),
        in_specs=[
            pl.BlockSpec((5, tile_rows, _LANES),
                         lambda c, t: (0, c * inner_tiles + t, 0)),
            pl.BlockSpec((5, tile_rows, _LANES),
                         lambda c, t: (0, c * inner_tiles + t, 0)),
        ],
        out_specs=pl.BlockSpec((2, strip, _LANES), lambda c, t: (c, 0, 0)),
        out_shape=jax.ShapeDtypeStruct((n_split * 2, strip, _LANES),
                                       jnp.float32),
        compiler_params=pltpu.CompilerParams(
            dimension_semantics=("parallel", "arbitrary"),
            vmem_limit_bytes=32 * 1024 * 1024),
    )(preds_cm, target_cm)

    ps = partial_sums.reshape(n_split, 2, strip, _LANES)
    box_sum = jnp.sum(ps[:, 0])
    bce_sum = jnp.sum(ps[:, 1])
    return (bce_coeff * bce_sum + box_sum) / n


# ----------------------------------------------------------------------------
# Pure-JAX reference mirroring the PyTorch module, for validation.
# ----------------------------------------------------------------------------
def _reference(preds, target, bce_coeff=0.2):
    preds = preds.astype(jnp.float32)
    target = target.astype(jnp.float32)
    n = preds.shape[0]
    p = jax.nn.sigmoid(preds[:, 1:5])
    t = target[:, 1:5]
    p0, p1, p2, p3 = p[:, 0], p[:, 1], p[:, 2], p[:, 3]
    t0, t1, t2, t3 = t[:, 0], t[:, 1], t[:, 2], t[:, 3]

    pred_area = jnp.abs(p2 - p0) * jnp.abs(p3 - p1)
    target_area = (t2 - t0) * (t3 - t1)
    x_p1 = jnp.minimum(p2, p0); x_p2 = jnp.maximum(p2, p0)
    y_p1 = jnp.minimum(p1, p3); y_p2 = jnp.maximum(p1, p3)
    x1 = jnp.maximum(x_p1, t0); x2 = jnp.minimum(x_p2, t2)
    y1 = jnp.maximum(y_p1, t1); y2 = jnp.minimum(y_p2, t3)
    overlap = (x2 - x1) * (y2 - y1)
    overlap = jnp.where(overlap < 0.0, 0.0, overlap)
    x1c = jnp.minimum(x_p1, t0); x2c = jnp.maximum(x_p2, t2)
    y1c = jnp.minimum(y_p1, t1); y2c = jnp.maximum(y_p2, t3)
    c_w = x2c - x1c; c_h = y2c - y1c
    w = x_p2 - x_p1; h = y_p2 - y_p1
    w_t = t2 - t0; h_t = t3 - t1
    iou = overlap / (target_area + pred_area - overlap)
    cpx = (x_p2 + x_p1) / 2.0; cpy = (y_p2 + y_p1) / 2.0
    ctx = (t2 + t0) / 2.0; cty = (t3 + t1) / 2.0
    diag = c_w ** 2 + c_h ** 2
    center_part = ((cpx - ctx) ** 2 + (cpy - cty) ** 2) / diag
    weight_part = (w - w_t) ** 2 / c_w ** 2
    height_part = (h - h_t) ** 2 / h_t ** 2
    eiou = iou - (center_part + weight_part + height_part)
    loss_sum = jnp.sum(1.0 - eiou)

    x = preds[:, 0]; y = target[:, 0]
    bce = jnp.mean(jnp.maximum(x, 0.0) - x * y + jnp.log1p(jnp.exp(-jnp.abs(x))))
    return bce_coeff * bce + loss_sum / n


def _make_inputs(key, n):
    """Deterministic, well-formed boxes: rows = [objectness, x1, y1, x2, y2]."""
    k1, k2, k3, k4, k5 = jax.random.split(key, 5)
    xy1 = jax.random.uniform(k1, (n, 2), minval=0.0, maxval=0.4)
    wh = jax.random.uniform(k2, (n, 2), minval=0.3, maxval=0.6)
    xy2 = xy1 + wh
    obj = jax.random.uniform(k3, (n, 1))
    target = jnp.concatenate([obj, xy1, xy2], axis=1)

    noisy = jnp.clip(target[:, 1:] + 0.05 * jax.random.normal(k4, (n, 4)),
                     0.05, 0.95)
    box_logits = jnp.log(noisy) - jnp.log1p(-noisy)          # logit(noisy)
    obj_logits = jax.random.normal(k5, (n, 1))
    preds = jnp.concatenate([obj_logits, box_logits], axis=1)
    return preds.astype(jnp.float32), target.astype(jnp.float32)


if __name__ == "__main__":
    key = jax.random.PRNGKey(0)
    k_a, k_b, k_c = jax.random.split(key, 3)

    # Case 1: small batch (N=50): single tile, single core split, tail masking.
    preds, target = _make_inputs(k_a, 50)
    out = jax.block_until_ready(efficient_iou_loss(preds, target, 0.2))
    ref = _reference(preds, target, 0.2)
    np.testing.assert_allclose(np.asarray(out), np.asarray(ref),
                               rtol=5e-3, atol=5e-3)

    # Case 2: default tiling (N=2000 -> one 16-row tile, 2-strip inner loop).
    preds2, target2 = _make_inputs(k_b, 2000)
    out2 = jax.block_until_ready(efficient_iou_loss(preds2, target2, 0.2))
    ref2 = _reference(preds2, target2, 0.2)
    np.testing.assert_allclose(np.asarray(out2), np.asarray(ref2),
                               rtol=5e-3, atol=5e-3)

    # Case 3: tiny tiles force multiple grid tiles + 2-way core split + a
    # fully padded trailing tile (N=3000, 8-row tiles -> 2x2 grid).
    preds3, target3 = _make_inputs(k_c, 3000)
    out3 = jax.block_until_ready(
        efficient_iou_loss(preds3, target3, 0.2,
                           max_tile_rows=8, num_core_splits=2))
    ref3 = _reference(preds3, target3, 0.2)
    np.testing.assert_allclose(np.asarray(out3), np.asarray(ref3),
                               rtol=5e-3, atol=5e-3)

    print("KERNEL_OK")
</pallas_src>

<mosaic_0001>
module attributes {stable_mosaic.version = 11 : i64} {
  func.func @_eiou_kernel(%arg0: i32, %arg1: i32, %arg2: memref<5x8x128xf32, #tpu.memory_space<vmem>>, %arg3: memref<5x8x128xf32, #tpu.memory_space<vmem>>, %arg4: memref<2x8x128xf32, #tpu.memory_space<vmem>>) attributes {dimension_semantics = [#tpu.dimension_semantics<parallel>, #tpu.dimension_semantics<arbitrary>], iteration_bounds = array<i64: 1, 1>, scalar_prefetch = 0 : i64, scratch_operands = 0 : i64, tpu.core_type = #tpu.core_type<tc>, window_params = [{transform_indices = @transform_0, window_bounds = array<i64: 5, 8, 128>}, {transform_indices = @transform_1, window_bounds = array<i64: 5, 8, 128>}, {transform_indices = @transform_2, window_bounds = array<i64: 2, 8, 128>}]} {
    %c1_i32 = arith.constant 1 : i32
    %0 = arith.muli %arg0, %c1_i32 : i32
    %1 = arith.addi %0, %arg1 : i32
    %c1024_i32 = arith.constant 1024 : i32
    %2 = arith.muli %1, %c1024_i32 : i32
    %3 = tpu.iota {dimensions = array<i32: 0>} : vector<8x128xi32>
    %c128_i32 = arith.constant 128 : i32
    %4 = vector.broadcast %c128_i32 : i32 to vector<8x128xi32>
    %5 = arith.muli %3, %4 : vector<8x128xi32>
    %6 = tpu.iota {dimensions = array<i32: 1>} : vector<8x128xi32>
    %7 = arith.addi %5, %6 : vector<8x128xi32>
    %c0_i32 = arith.constant 0 : i32
    %8 = arith.cmpi eq, %arg1, %c0_i32 : i32
    %9 = arith.extui %8 : i1 to i32
    %c0_i32_0 = arith.constant 0 : i32
    %10 = arith.cmpi ne, %9, %c0_i32_0 : i32
    scf.if %10 {
      %cst_51 = arith.constant 0.000000e+00 : f32
      %170 = vector.broadcast %cst_51 : f32 to vector<2x8x128xf32>
      %c0_52 = arith.constant 0 : index
      %c0_53 = arith.constant 0 : index
      %c0_54 = arith.constant 0 : index
      %171 = vector.load %arg4[%c0_52, %c0_53, %c0_54] : memref<2x8x128xf32, #tpu.memory_space<vmem>>, vector<2x8x128xf32>
      tpu.vector_store %arg4[%c0_52, %c0_53, %c0_54], %170 {strides = array<i32>} : memref<2x8x128xf32, #tpu.memory_space<vmem>>, vector<2x8x128xf32>,
    } else {
    }
    %cst = arith.constant 0.000000e+00 : f32
    %11 = vector.broadcast %cst : f32 to vector<8x128xf32>
    %c0_i32_1 = arith.constant 0 : i32
    %c8_i32 = arith.constant 8 : i32
    %12 = arith.muli %c0_i32_1, %c8_i32 : i32
    %13 = tpu.assume_multiple %12, 8 : i32
    %c1 = arith.constant 1 : index
    %14 = arith.index_cast %13 : i32 to index
    %c0 = arith.constant 0 : index
    %15 = vector.load %arg2[%c1, %14, %c0] : memref<5x8x128xf32, #tpu.memory_space<vmem>>, vector<1x8x128xf32>
    %16 = vector.shape_cast %15 : vector<1x8x128xf32> to vector<8x128xf32>
    %cst_2 = arith.constant 5.000000e-01 : f32
    %17 = vector.broadcast %cst_2 : f32 to vector<8x128xf32>
    %18 = arith.mulf %17, %16 : vector<8x128xf32>
    %19 = math.tanh %18 : vector<8x128xf32>
    %cst_3 = arith.constant 5.000000e-01 : f32
    %20 = vector.broadcast %cst_3 : f32 to vector<8x128xf32>
    %21 = arith.mulf %20, %19 : vector<8x128xf32>
    %cst_4 = arith.constant 5.000000e-01 : f32
    %22 = vector.broadcast %cst_4 : f32 to vector<8x128xf32>
    %23 = arith.addf %21, %22 : vector<8x128xf32>
    %c2 = arith.constant 2 : index
    %24 = arith.index_cast %13 : i32 to index
    %c0_5 = arith.constant 0 : index
    %25 = vector.load %arg2[%c2, %24, %c0_5] : memref<5x8x128xf32, #tpu.memory_space<vmem>>, vector<1x8x128xf32>
    %26 = vector.shape_cast %25 : vector<1x8x128xf32> to vector<8x128xf32>
    %cst_6 = arith.constant 5.000000e-01 : f32
    %27 = vector.broadcast %cst_6 : f32 to vector<8x128xf32>
    %28 = arith.mulf %27, %26 : vector<8x128xf32>
    %29 = math.tanh %28 : vector<8x128xf32>
    %cst_7 = arith.constant 5.000000e-01 : f32
    %30 = vector.broadcast %cst_7 : f32 to vector<8x128xf32>
    %31 = arith.mulf %30, %29 : vector<8x128xf32>
    %cst_8 = arith.constant 5.000000e-01 : f32
    %32 = vector.broadcast %cst_8 : f32 to vector<8x128xf32>
    %33 = arith.addf %31, %32 : vector<8x128xf32>
    %c3 = arith.constant 3 : index
    %34 = arith.index_cast %13 : i32 to index
    %c0_9 = arith.constant 0 : index
    %35 = vector.load %arg2[%c3, %34, %c0_9] : memref<5x8x128xf32, #tpu.memory_space<vmem>>, vector<1x8x128xf32>
    %36 = vector.shape_cast %35 : vector<1x8x128xf32> to vector<8x128xf32>
    %cst_10 = arith.constant 5.000000e-01 : f32
    %37 = vector.broadcast %cst_10 : f32 to vector<8x128xf32>
    %38 = arith.mulf %37, %36 : vector<8x128xf32>
    %39 = math.tanh %38 : vector<8x128xf32>
    %cst_11 = arith.constant 5.000000e-01 : f32
    %40 = vector.broadcast %cst_11 : f32 to vector<8x128xf32>
    %41 = arith.mulf %40, %39 : vector<8x128xf32>
    %cst_12 = arith.constant 5.000000e-01 : f32
    %42 = vector.broadcast %cst_12 : f32 to vector<8x128xf32>
    %43 = arith.addf %41, %42 : vector<8x128xf32>
    %c4 = arith.constant 4 : index
    %44 = arith.index_cast %13 : i32 to index
    %c0_13 = arith.constant 0 : index
    %45 = vector.load %arg2[%c4, %44, %c0_13] : memref<5x8x128xf32, #tpu.memory_space<vmem>>, vector<1x8x128xf32>
    %46 = vector.shape_cast %45 : vector<1x8x128xf32> to vector<8x128xf32>
    %cst_14 = arith.constant 5.000000e-01 : f32
    %47 = vector.broadcast %cst_14 : f32 to vector<8x128xf32>
    %48 = arith.mulf %47, %46 : vector<8x128xf32>
    %49 = math.tanh %48 : vector<8x128xf32>
    %cst_15 = arith.constant 5.000000e-01 : f32
    %50 = vector.broadcast %cst_15 : f32 to vector<8x128xf32>
    %51 = arith.mulf %50, %49 : vector<8x128xf32>
    %cst_16 = arith.constant 5.000000e-01 : f32
    %52 = vector.broadcast %cst_16 : f32 to vector<8x128xf32>
    %53 = arith.addf %51, %52 : vector<8x128xf32>
    %c1_17 = arith.constant 1 : index
    %54 = arith.index_cast %13 : i32 to index
    %c0_18 = arith.constant 0 : index
    %55 = vector.load %arg3[%c1_17, %54, %c0_18] : memref<5x8x128xf32, #tpu.memory_space<vmem>>, vector<1x8x128xf32>
    %56 = vector.shape_cast %55 : vector<1x8x128xf32> to vector<8x128xf32>
    %c2_19 = arith.constant 2 : index
    %57 = arith.index_cast %13 : i32 to index
    %c0_20 = arith.constant 0 : index
    %58 = vector.load %arg3[%c2_19, %57, %c0_20] : memref<5x8x128xf32, #tpu.memory_space<vmem>>, vector<1x8x128xf32>
    %59 = vector.shape_cast %58 : vector<1x8x128xf32> to vector<8x128xf32>
    %c3_21 = arith.constant 3 : index
    %60 = arith.index_cast %13 : i32 to index
    %c0_22 = arith.constant 0 : index
    %61 = vector.load %arg3[%c3_21, %60, %c0_22] : memref<5x8x128xf32, #tpu.memory_space<vmem>>, vector<1x8x128xf32>
    %62 = vector.shape_cast %61 : vector<1x8x128xf32> to vector<8x128xf32>
    %c4_23 = arith.constant 4 : index
    %63 = arith.index_cast %13 : i32 to index
    %c0_24 = arith.constant 0 : index
    %64 = vector.load %arg3[%c4_23, %63, %c0_24] : memref<5x8x128xf32, #tpu.memory_space<vmem>>, vector<1x8x128xf32>
    %65 = vector.shape_cast %64 : vector<1x8x128xf32> to vector<8x128xf32>
    %66 = arith.minimumf %23, %43 : vector<8x128xf32>
    %67 = arith.maximumf %23, %43 : vector<8x128xf32>
    %68 = arith.minimumf %33, %53 : vector<8x128xf32>
    %69 = arith.maximumf %33, %53 : vector<8x128xf32>
    %70 = arith.maximumf %66, %56 : vector<8x128xf32>
    %71 = arith.minimumf %67, %62 : vector<8x128xf32>
    %72 = arith.maximumf %68, %59 : vector<8x128xf32>
    %73 = arith.minimumf %69, %65 : vector<8x128xf32>
    %74 = arith.subf %71, %70 : vector<8x128xf32>
    %75 = arith.subf %73, %72 : vector<8x128xf32>
    %76 = arith.mulf %74, %75 : vector<8x128xf32>
    %cst_25 = arith.constant 0.000000e+00 : f32
    %77 = vector.broadcast %cst_25 : f32 to vector<8x128xf32>
    %78 = arith.maximumf %76, %77 : vector<8x128xf32>
    %79 = arith.maximumf %67, %62 : vector<8x128xf32>
    %80 = arith.minimumf %66, %56 : vector<8x128xf32>
    %81 = arith.subf %79, %80 : vector<8x128xf32>
    %82 = arith.maximumf %69, %65 : vector<8x128xf32>
    %83 = arith.minimumf %68, %59 : vector<8x128xf32>
    %84 = arith.subf %82, %83 : vector<8x128xf32>
    %85 = arith.subf %67, %66 : vector<8x128xf32>
    %86 = arith.subf %69, %68 : vector<8x128xf32>
    %87 = arith.subf %62, %56 : vector<8x128xf32>
    %88 = arith.subf %65, %59 : vector<8x128xf32>
    %89 = arith.mulf %87, %88 : vector<8x128xf32>
    %90 = arith.mulf %85, %86 : vector<8x128xf32>
    %91 = arith.addf %89, %90 : vector<8x128xf32>
    %92 = arith.subf %91, %78 : vector<8x128xf32>
    %93 = arith.addf %67, %66 : vector<8x128xf32>
    %94 = arith.addf %62, %56 : vector<8x128xf32>
    %95 = arith.subf %93, %94 : vector<8x128xf32>
    %cst_26 = arith.constant 5.000000e-01 : f32
    %96 = vector.broadcast %cst_26 : f32 to vector<8x128xf32>
    %97 = arith.mulf %96, %95 : vector<8x128xf32>
    %98 = arith.addf %69, %68 : vector<8x128xf32>
    %99 = arith.addf %65, %59 : vector<8x128xf32>
    %100 = arith.subf %98, %99 : vector<8x128xf32>
    %cst_27 = arith.constant 5.000000e-01 : f32
    %101 = vector.broadcast %cst_27 : f32 to vector<8x128xf32>
    %102 = arith.mulf %101, %100 : vector<8x128xf32>
    %103 = arith.mulf %81, %81 : vector<8x128xf32>
    %104 = arith.mulf %84, %84 : vector<8x128xf32>
    %105 = arith.addf %103, %104 : vector<8x128xf32>
    %106 = arith.mulf %92, %105 : vector<8x128xf32>
    %107 = tpu.reciprocal %106 {approx = true} : vector<8x128xf32> -> vector<8x128xf32>
    %108 = arith.mulf %78, %105 : vector<8x128xf32>
    %109 = arith.mulf %108, %107 : vector<8x128xf32>
    %110 = arith.mulf %97, %97 : vector<8x128xf32>
    %111 = arith.mulf %102, %102 : vector<8x128xf32>
    %112 = arith.addf %110, %111 : vector<8x128xf32>
    %113 = arith.mulf %112, %92 : vector<8x128xf32>
    %114 = arith.mulf %113, %107 : vector<8x128xf32>
    %115 = arith.mulf %88, %88 : vector<8x128xf32>
    %116 = arith.subf %85, %87 : vector<8x128xf32>
    %117 = arith.subf %86, %88 : vector<8x128xf32>
    %118 = arith.mulf %103, %115 : vector<8x128xf32>
    %119 = tpu.reciprocal %118 {approx = true} : vector<8x128xf32> -> vector<8x128xf32>
    %120 = arith.mulf %116, %116 : vector<8x128xf32>
    %121 = arith.mulf %120, %115 : vector<8x128xf32>
    %122 = arith.mulf %121, %119 : vector<8x128xf32>
    %123 = arith.mulf %117, %117 : vector<8x128xf32>
    %124 = arith.mulf %123, %103 : vector<8x128xf32>
    %125 = arith.mulf %124, %119 : vector<8x128xf32>
    %126 = arith.addf %114, %122 : vector<8x128xf32>
    %127 = arith.addf %126, %125 : vector<8x128xf32>
    %128 = arith.subf %109, %127 : vector<8x128xf32>
    %cst_28 = arith.constant 1.000000e+00 : f32
    %129 = vector.broadcast %cst_28 : f32 to vector<8x128xf32>
    %130 = arith.subf %129, %128 : vector<8x128xf32>
    %c0_29 = arith.constant 0 : index
    %131 = arith.index_cast %13 : i32 to index
    %c0_30 = arith.constant 0 : index
    %132 = vector.load %arg2[%c0_29, %131, %c0_30] : memref<5x8x128xf32, #tpu.memory_space<vmem>>, vector<1x8x128xf32>
    %133 = vector.shape_cast %132 : vector<1x8x128xf32> to vector<8x128xf32>
    %c0_31 = arith.constant 0 : index
    %134 = arith.index_cast %13 : i32 to index
    %c0_32 = arith.constant 0 : index
    %135 = vector.load %arg3[%c0_31, %134, %c0_32] : memref<5x8x128xf32, #tpu.memory_space<vmem>>, vector<1x8x128xf32>
    %136 = vector.shape_cast %135 : vector<1x8x128xf32> to vector<8x128xf32>
    %cst_33 = arith.constant 0.000000e+00 : f32
    %137 = vector.broadcast %cst_33 : f32 to vector<8x128xf32>
    %138 = arith.maximumf %133, %137 : vector<8x128xf32>
    %139 = arith.mulf %133, %136 : vector<8x128xf32>
    %140 = arith.subf %138, %139 : vector<8x128xf32>
    %141 = math.absf %133 : vector<8x128xf32>
    %cst_34 = arith.constant 0.000000e+00 : f32
    %142 = vector.broadcast %cst_34 : f32 to vector<8x128xf32>
    %143 = arith.subf %142, %141 : vector<8x128xf32>
    %144 = math.exp %143 : vector<8x128xf32>
    %145 = math.log1p %144 : vector<8x128xf32>
    %146 = arith.addf %140, %145 : vector<8x128xf32>
    %c50_i32 = arith.constant 50 : i32
    %147 = arith.subi %c50_i32, %2 : i32
    %c1024_i32_35 = arith.constant 1024 : i32
    %148 = arith.muli %c0_i32_1, %c1024_i32_35 : i32
    %149 = arith.subi %147, %148 : i32
    %150 = vector.broadcast %149 : i32 to vector<8x128xi32>
    %151 = arith.cmpi slt, %7, %150 : vector<8x128xi32>
    %cst_36 = arith.constant 0.000000e+00 : f32
    %152 = vector.broadcast %cst_36 : f32 to vector<8x128xf32>
    %153 = arith.select %151, %130, %152 : vector<8x128xi1>, vector<8x128xf32>
    %154 = arith.addf %11, %153 : vector<8x128xf32>
    %cst_37 = arith.constant 0.000000e+00 : f32
    %155 = vector.broadcast %cst_37 : f32 to vector<8x128xf32>
    %156 = arith.select %151, %146, %155 : vector<8x128xi1>, vector<8x128xf32>
    %157 = arith.addf %11, %156 : vector<8x128xf32>
    %c1_i32_38 = arith.constant 1 : i32
    %c0_39 = arith.constant 0 : index
    %c0_40 = arith.constant 0 : index
    %c0_41 = arith.constant 0 : index
    %158 = vector.load %arg4[%c0_39, %c0_40, %c0_41] : memref<2x8x128xf32, #tpu.memory_space<vmem>>, vector<1x8x128xf32>
    %159 = vector.shape_cast %158 : vector<1x8x128xf32> to vector<8x128xf32>
    %160 = arith.addf %159, %154 : vector<8x128xf32>
    %c0_42 = arith.constant 0 : index
    %c0_43 = arith.constant 0 : index
    %c0_44 = arith.constant 0 : index
    %161 = vector.load %arg4[%c0_42, %c0_43, %c0_44] : memref<2x8x128xf32, #tpu.memory_space<vmem>>, vector<1x8x128xf32>
    %162 = vector.shape_cast %161 : vector<1x8x128xf32> to vector<8x128xf32>
    %163 = vector.shape_cast %160 : vector<8x128xf32> to vector<1x8x128xf32>
    tpu.vector_store %arg4[%c0_42, %c0_43, %c0_44], %163 {strides = array<i32>} : memref<2x8x128xf32, #tpu.memory_space<vmem>>, vector<1x8x128xf32>,
    %c1_45 = arith.constant 1 : index
    %c0_46 = arith.constant 0 : index
    %c0_47 = arith.constant 0 : index
    %164 = vector.load %arg4[%c1_45, %c0_46, %c0_47] : memref<2x8x128xf32, #tpu.memory_space<vmem>>, vector<1x8x128xf32>
    %165 = vector.shape_cast %164 : vector<1x8x128xf32> to vector<8x128xf32>
    %166 = arith.addf %165, %157 : vector<8x128xf32>
    %c1_48 = arith.constant 1 : index
    %c0_49 = arith.constant 0 : index
    %c0_50 = arith.constant 0 : index
    %167 = vector.load %arg4[%c1_48, %c0_49, %c0_50] : memref<2x8x128xf32, #tpu.memory_space<vmem>>, vector<1x8x128xf32>
    %168 = vector.shape_cast %167 : vector<1x8x128xf32> to vector<8x128xf32>
    %169 = vector.shape_cast %166 : vector<8x128xf32> to vector<1x8x128xf32>
    tpu.vector_store %arg4[%c1_48, %c0_49, %c0_50], %169 {strides = array<i32>} : memref<2x8x128xf32, #tpu.memory_space<vmem>>, vector<1x8x128xf32>,
    return
  }
  func.func @transform_0(%arg0: i32, %arg1: i32) -> (i32, i32, i32) {
    %c1_i32 = arith.constant 1 : i32
    %0 = arith.muli %arg0, %c1_i32 : i32
    %1 = arith.addi %0, %arg1 : i32
    %c0_i32 = arith.constant 0 : i32
    %c0_i32_0 = arith.constant 0 : i32
    %c0_i32_1 = arith.constant 0 : i32
    return %c0_i32, %1, %c0_i32_0 : i32, i32, i32
  }
  func.func @transform_1(%arg0: i32, %arg1: i32) -> (i32, i32, i32) {
    %c1_i32 = arith.constant 1 : i32
    %0 = arith.muli %arg0, %c1_i32 : i32
    %1 = arith.addi %0, %arg1 : i32
    %c0_i32 = arith.constant 0 : i32
    %c0_i32_0 = arith.constant 0 : i32
    %c0_i32_1 = arith.constant 0 : i32
    return %c0_i32, %1, %c0_i32_0 : i32, i32, i32
  }
  func.func @transform_2(%arg0: i32, %arg1: i32) -> (i32, i32, i32) {
    %c0_i32 = arith.constant 0 : i32
    %c0_i32_0 = arith.constant 0 : i32
    %c0_i32_1 = arith.constant 0 : i32
    return %arg0, %c0_i32, %c0_i32_0 : i32, i32, i32
  }
}

</mosaic_0001>

<bundles_post_ra>
// kernel: efficient_iou_loss.1
= control target key start
LH: loop header
LB: loop body
LE: loop exit
PB: predicated region body
PF: predicated region fallthrough
CT: control target
= control target key end

     0   :  { %v47_v63 = vlaneseq  ;;  %s296_s0 = inlined_call_operand.vmem [shape: f32[5,8,128], index: 0, kind: input, shape index: {}]   ;;  %s297_s1 = inlined_call_operand.vmem [shape: f32[5,8,128], index: 1, kind: input, shape index: {}]   ;;  %s298_s2 = inlined_call_operand.vmem [shape: f32[2,8,128], index: 2, kind: output, shape index: {}]  }
   0x1   :  { %v213_v0 = vld [vmem:[%s296_s0 + $0x8] sm:$0xff]  ;;  %v214_v1 = vld [vmem:[%s296_s0 + $0x10] sm:$0xff]  ;;  %v215_v2 = vld [vmem:[%s296_s0 + $0x18] sm:$0xff] }
   0x2   :  { %v62_v3 = vmul.f32 0.5, %v213_v0  ;;  %v69_v4 = vmul.f32 0.5, %v214_v1  ;;  %v216_v5 = vld [vmem:[%s296_s0 + $0x20] sm:$0xff]  ;;  %v76_v6 = vmul.f32 0.5, %v215_v2  ;;  %v217_v17 = vld [vmem:[%s297_s1 + $0x8] sm:$0xff]  ;;  %v219_v18 = vld [vmem:[%s297_s1 + $0x18] sm:$0xff] }
   0x3   :  { %v83_v7 = vmul.f32 0.5, %v216_v5  ;;  %v270_v8 = vld [vmem:[%s296_s0] sm:$0xff]  ;;  %v218_v22 = vld [vmem:[%s297_s1 + $0x10] sm:$0xff]  ;;  %v115_v24 = vsub.f32 %v219_v18, %v217_v17  ;;  %v122_v32 = vadd.f32 %v219_v18, %v217_v17 }
   0x4   :  { %224 = vtanh.f32 %v62_v3  ;;  %v161_v9 = vand.u32 2147483647, %v270_v8  ;;  %v220_v23 = vld [vmem:[%s297_s1 + $0x20] sm:$0xff] }
   0x5   :  { %226 = vtanh.f32 %v69_v4  ;;  %v116_v27 = vsub.f32 %v220_v23, %v218_v22  ;;  %v126_v33 = vadd.f32 %v220_v23, %v218_v22 }
   0x6   :  { %228 = vtanh.f32 %v76_v6  ;;  %v162_v10 = vsub.f32 0.0, %v161_v9 }
   0x7   :  { %230 = vtanh.f32 %v83_v7  ;;  %v117_v36 = vmul.f32 %v116_v27, %v115_v24  ;;  %v141_v37 = vmul.f32 %v116_v27, %v116_v27  ;;  %v48_v7 = vshrl.u32 %v47_v63, 7 }
   0x8   :  { %v163_v12 = vmul.f32 1.442695, %v162_v10 }
   0xa   :  { %232 = vpow2.f32 %v163_v12 }
   0xe   :  { %v225_v11 = vpop.eup %224 }
   0xf   :  { %v227_v13 = vpop.eup %226  ;;  %v64_v14 = vmul.f32 0.5, %v225_v11 }
  0x10   :  { %v229_v15 = vpop.eup %228  ;;  %v71_v16 = vmul.f32 0.5, %v227_v13 }
  0x11   :  { %v231_v19 = vpop.eup %230  ;;  %v65_v20 = vadd.f32 0.5, %v64_v14  ;;  %v78_v21 = vmul.f32 0.5, %v229_v15  ;;  %v157_v14 = vld [vmem:[%s297_s1] sm:$0xff] }
  0x12   :  { %v72_v25 = vadd.f32 0.5, %v71_v16  ;;  %v85_v26 = vmul.f32 0.5, %v231_v19  ;;  %v49_v16 = vmul.u32 128, %v48_v7 }
  0x13   :  { %v79_v28 = vadd.f32 0.5, %v78_v21 }
  0x14   :  { %v86_v29 = vadd.f32 0.5, %v85_v26  ;;  %v233_v56 = vpop.eup %232 }
  0x15   :  { %v95_v30 = vmin.f32 %v65_v20, %v79_v28  ;;  %v96_v31 = vmax.f32 %v65_v20, %v79_v28  ;;  %v165_v4 = vadd.f32 1.0, %v233_v56  ;;  %v168_v10 = vmul.f32 -0.5, %v233_v56 }
  0x16   :  { %v97_v34 = vmin.f32 %v72_v25, %v86_v29  ;;  %v98_v35 = vmax.f32 %v72_v25, %v86_v29 }
  0x17   :  { %v99_v38 = vmax.f32 %v95_v30, %v217_v17  ;;  %v100_v39 = vmin.f32 %v96_v31, %v219_v18  ;;  %v107_v40 = vmax.f32 %v96_v31, %v219_v18  ;;  %v108_v41 = vmin.f32 %v95_v30, %v217_v17 }
  0x18   :  { %v101_v42 = vmax.f32 %v97_v34, %v218_v22  ;;  %v102_v43 = vmin.f32 %v98_v35, %v220_v23  ;;  %v110_v44 = vmax.f32 %v98_v35, %v220_v23  ;;  %v111_v45 = vmin.f32 %v97_v34, %v218_v22 }
  0x19   :  { %v103_v46 = vsub.f32 %v100_v39, %v99_v38  ;;  %v109_v47 = vsub.f32 %v107_v40, %v108_v41  ;;  %v113_v48 = vsub.f32 %v96_v31, %v95_v30  ;;  %v114_v49 = vsub.f32 %v98_v35, %v97_v34 }
  0x1a   :  { %v104_v50 = vsub.f32 %v102_v43, %v101_v42  ;;  %v112_v51 = vsub.f32 %v110_v44, %v111_v45  ;;  %v121_v52 = vadd.f32 %v96_v31, %v95_v30  ;;  %v125_v53 = vadd.f32 %v98_v35, %v97_v34 }
  0x1b   :  { %v118_v54 = vmul.f32 %v114_v49, %v113_v48  ;;  %v129_v55 = vmul.f32 %v109_v47, %v109_v47  ;;  %v142_v6 = vsub.f32 %v113_v48, %v115_v24  ;;  %v143_v13 = vsub.f32 %v114_v49, %v116_v27 }
  0x1c   :  { %v105_v57 = vmul.f32 %v104_v50, %v103_v46  ;;  %v123_v58 = vsub.f32 %v121_v52, %v122_v32  ;;  %v127_v59 = vsub.f32 %v125_v53, %v126_v33  ;;  %v130_v60 = vmul.f32 %v112_v51, %v112_v51 }
  0x1d   :  { %v119_v61 = vadd.f32 %v118_v54, %v117_v36  ;;  %v144_v62 = vmul.f32 %v141_v37, %v129_v55  ;;  %v146_v15 = vmul.f32 %v142_v6, %v142_v6  ;;  %v51_v17 = vand.u32 127, %v47_v63 }
  0x1e   :  { %v106_v0 = vmax.f32 %v105_v57, 0.0  ;;  %v131_v1 = vadd.f32 %v130_v60, %v129_v55  ;;  %v124_v2 = vmul.f32 0.5, %v123_v58  ;;  %v128_v3 = vmul.f32 0.5, %v127_v59 }
  0x1f   :  { %234 = vrcp.f32 %v144_v62  ;;  %v158_v18 = vmax.f32 %v270_v8, 0.0  ;;  %v169_v19 = vadd.f32 1.0, %v168_v10  ;;  %v149_v21 = vmul.f32 %v143_v13, %v143_v13 }
  0x20   :  { %v120_v5 = vsub.f32 %v119_v61, %v106_v0  ;;  %236 = vlog2.f32 %v165_v4  ;;  %v136_v11 = vmul.f32 %v124_v2, %v124_v2  ;;  %v137_v12 = vmul.f32 %v128_v3, %v128_v3 }
  0x21   :  { %v159_v22 = vmul.f32 %v157_v14, %v270_v8  ;;  %v171_v23 = vand.u32 2147483647, %v233_v56  ;;  %v147_v24 = vmul.f32 %v146_v15, %v141_v37  ;;  %v52_v26 = vadd.s32 %v51_v17, %v49_v16 }
  0x22   :  { %v132_v9 = vmul.f32 %v131_v1, %v120_v5  ;;  %v138_v20 = vadd.f32 %v137_v12, %v136_v11  ;;  %v170_v27 = vmul.f32 %v233_v56, %v169_v19  ;;  %v150_v30 = vmul.f32 %v149_v21, %v129_v55 }
  0x23   :  { %v160_v31 = vsub.f32 %v158_v18, %v159_v22  ;;  %vm172_vm0 = vcmp.lt.f32.partialorder %v171_v23, 0.0004427343  ;;  %v134_v33 = vmul.f32 %v131_v1, %v106_v0  ;;  %vm177_vm1 = vcmp.lt.s32.totalorder %v52_v26, 50 }
  0x24   :  { %238 = vrcp.f32 %v132_v9  ;;  %v139_v29 = vmul.f32 %v138_v20, %v120_v5 }
  0x29   :  { %v235_v25 = vpop.eup %234 }
  0x2a   :  { %v237_v28 = vpop.eup %236  ;;  %v148_v34 = vmul.f32 %v235_v25, %v147_v24  ;;  %v151_v39 = vmul.f32 %v235_v25, %v150_v30 }
  0x2b   :  { %v167_v32 = vmul.f32 0.6931472, %v237_v28 }
  0x2d   :  { %v173_v36 = vsel %vm172_vm0, %v170_v27, %v167_v32 }
  0x2e   :  { %v239_v35 = vpop.eup %238  ;;  %v174_v40 = vadd.f32 %v173_v36, %v160_v31 }
  0x2f   :  { %v140_v38 = vmul.f32 %v239_v35, %v139_v29  ;;  %v135_v8 = vmul.f32 %v239_v35, %v134_v33 }
  0x30   :  { %v180_v37 = vsel %vm177_vm1, %v174_v40, 0.0 }
  0x31   :  { %v152_v41 = vadd.f32 %v148_v34, %v140_v38  ;;  %222 = vst [vmem:[%s298_s2 + $0x8] sm:$0xff] %v180_v37 }
  0x33   :  { %v153_v42 = vadd.f32 %v152_v41, %v151_v39 }
  0x35   :  { %v154_v43 = vsub.f32 %v135_v8, %v153_v42 }
  0x37   :  { %v155_v44 = vsub.f32 1.0, %v154_v43 }
  0x39   :  { %v178_v45 = vsel %vm177_vm1, %v155_v44, 0.0 }
  0x3a   :  { %184 = vst [vmem:[%s298_s2] sm:$0xff] %v178_v45 }

</bundles_post_ra>
